<compile_context>
chip_gen: v6e
topology: v6e:2x2x1
jax: 0.10.0
libtpu: 0.0.40
codegen_flags: <defaults>
</compile_context>

<pallas_src>
import jax
import jax.numpy as jnp
from jax.experimental import pallas as pl
from jax.experimental.pallas import tpu as pltpu

_LANE = 128
_SUBLANE = 8
_BLOCK_BYTES = 2 * 1024 * 1024          # ~2 MiB per pipelined block buffer
_SINGLE_BLOCK_BYTES = 4 * 1024 * 1024   # whole-array single-block copy below this
_WIDTHS = (8192, 4096, 2048, 1024, 512, 256, 128)  # lane-dense slab widths


def _copy_kernel(x_ref, o_ref):
    # Identity copy of the current block through VMEM.
    o_ref[...] = x_ref[...]


def _resolve_view_shape(numel, shape):
    """Resolve a single -1 the same way torch.Tensor.view does."""
    shape = list(shape)
    if -1 in shape:
        idx = shape.index(-1)
        known = 1
        for i, s in enumerate(shape):
            if i != idx:
                known *= int(s)
        assert known > 0 and numel % known == 0, "view shape incompatible with input size"
        shape[idx] = numel // known
    total = 1
    for s in shape:
        total *= int(s)
    assert total == numel, "view shape incompatible with input size"
    return tuple(int(s) for s in shape)


def _copy_whole(arr):
    """Single-block identity copy: one DMA in, one DMA out, no grid."""
    return pl.pallas_call(
        _copy_kernel,
        out_shape=jax.ShapeDtypeStruct(arr.shape, arr.dtype),
    )(arr)


def _copy_slab(slab):
    """Tiled identity copy of a 2-D (rows, width) slab, width % 128 == 0."""
    rows, width = slab.shape
    itemsize = jnp.dtype(slab.dtype).itemsize
    # Sub-32-bit dtypes pack along sublanes -> scale the row multiple
    # (8 rows f32, 16 rows bf16, 32 rows int8/fp8).
    row_mult = _SUBLANE * max(1, 4 // itemsize)
    block_rows = (_BLOCK_BYTES // (width * itemsize)) // row_mult * row_mult
    block_rows = max(block_rows, row_mult)

    if block_rows >= rows:
        # Whole slab fits well within scoped VMEM: skip the grid entirely.
        return _copy_whole(slab)

    grid = (pl.cdiv(rows, block_rows),)
    return pl.pallas_call(
        _copy_kernel,
        out_shape=jax.ShapeDtypeStruct((rows, width), slab.dtype),
        grid_spec=pl.GridSpec(
            grid=grid,
            in_specs=[pl.BlockSpec((block_rows, width), lambda i: (i, 0))],
            out_specs=pl.BlockSpec((block_rows, width), lambda i: (i, 0)),
        ),
        compiler_params=pltpu.CompilerParams(
            dimension_semantics=("parallel",),
        ),
    )(slab)


def _copy_flat(flat):
    """Identity-copy a flat 1-D element stream through VMEM."""
    numel = flat.shape[0]
    itemsize = jnp.dtype(flat.dtype).itemsize

    # Widest lane-dense slab width that divides the element count exactly
    # (avoids any pad / tail-slice HBM passes).
    width = next((w for w in _WIDTHS if numel % w == 0), None)
    if width is not None:
        slab = jnp.reshape(flat, (numel // width, width))   # metadata-only
        return jnp.reshape(_copy_slab(slab), (numel,))

    # Irregular element counts (not a multiple of 128): small -> single block.
    if numel * itemsize <= _SINGLE_BLOCK_BYTES:
        return _copy_whole(flat)

    # Rare large + irregular case: minimal pad (<8192 elems) to a lane-dense
    # slab, copy, trim.  Only triggers when no multiple-of-128 width divides.
    pad_to = 8192
    padded = ((numel + pad_to - 1) // pad_to) * pad_to
    slab = jnp.reshape(jnp.pad(flat, (0, padded - numel)), (padded // pad_to, pad_to))
    return jnp.reshape(_copy_slab(slab), (padded,))[:numel]


def view_pallas(x, shape):
    """Equivalent of PyTorch View(shape)(x): row-major reinterpret as `shape`.

    The element stream is materialized by a Pallas identity-copy kernel; the
    reshape itself is metadata-only glue (same semantics as torch .view on a
    contiguous tensor: no data reordering).
    """
    numel = x.size
    out_shape = _resolve_view_shape(numel, shape)
    if numel == 0:
        return jnp.reshape(x, out_shape)
    flat = jnp.reshape(x, (numel,))   # metadata-only row-major flatten
    return jnp.reshape(_copy_flat(flat), out_shape)


if __name__ == "__main__":
    key = jax.random.PRNGKey(0)
    # Small NCHW-like input, as would feed View((-1, C*H*W)) inside a CVAE.
    x = jax.random.normal(key, (2, 4, 16, 16), dtype=jnp.float32)

    target_shape = (-1, 4 * 16 * 16)  # View((-1, 1024))
    y = view_pallas(x, target_shape)
    y = jax.block_until_ready(y)

    ref = jnp.reshape(x, (2, 4 * 16 * 16))
    assert y.shape == (2, 1024), y.shape
    assert y.dtype == x.dtype
    assert bool(jnp.all(y == ref))

    # Also exercise the tiled large-block path (lane-dense slab, multi-step grid).
    x2 = jax.random.normal(jax.random.PRNGKey(1), (1024, 4096), dtype=jnp.float32)
    y2 = jax.block_until_ready(view_pallas(x2, (4096, 1024)))
    assert y2.shape == (4096, 1024)
    assert bool(jnp.all(jnp.reshape(y2, (-1,)) == jnp.reshape(x2, (-1,))))

    print("KERNEL_OK")
</pallas_src>

<mosaic_0001>
module attributes {stable_mosaic.version = 11 : i64} {
  func.func @_copy_kernel(%arg0: memref<1x2048xf32, #tpu.memory_space<vmem>>, %arg1: memref<1x2048xf32, #tpu.memory_space<vmem>>) attributes {dimension_semantics = [], scalar_prefetch = 0 : i64, scratch_operands = 0 : i64, tpu.core_type = #tpu.core_type<tc>} {
    %c0 = arith.constant 0 : index
    %c0_0 = arith.constant 0 : index
    %0 = vector.load %arg0[%c0, %c0_0] : memref<1x2048xf32, #tpu.memory_space<vmem>>, vector<1x2048xf32>
    %c0_1 = arith.constant 0 : index
    %c0_2 = arith.constant 0 : index
    %1 = vector.load %arg1[%c0_1, %c0_2] : memref<1x2048xf32, #tpu.memory_space<vmem>>, vector<1x2048xf32>
    tpu.vector_store %arg1[%c0_1, %c0_2], %0 {strides = array<i32>} : memref<1x2048xf32, #tpu.memory_space<vmem>>, vector<1x2048xf32>,
    return
  }
}

</mosaic_0001>

<bundles_post_ra>
// kernel: tpu_custom_call.1
= control target key start
LH: loop header
LB: loop body
LE: loop exit
PB: predicated region body
PF: predicated region fallthrough
CT: control target
= control target key end

     0   :  { %6 = vsyncpa [#allocation3], 0  ;;  %s104_s0 = inlined_call_operand.hbm [shape: f32[1,2048], index: 0, kind: input, shape index: {}]   ;;  %s105_s1 = inlined_call_operand.hbm [shape: f32[1,2048], index: 1, kind: output, shape index: {}]  }
   0x1   :  { %7 = vsyncpa [#allocation4], 0  ;;  %s86_s6 = smov [#allocation2]  }
   0x2   :  { %s14_s7 = sshll.u32 %s86_s6, 4  ;;  %s15_s7 = int_to_ptr.vmem [resolvable:$true] %s14_s7 }
   0x3   :  { %s50_s8 = scalar_lea.vmem %s15_s7, 256  ;;  %p55_p1 = scmp.lt.s32.totalorder %s15_s7, %s15_s7 }
   0x4   :  { %p51_p0 = scmp.ne.s32.totalorder %s15_s7, %s50_s8  ;;  %p56_p2 = scmp.lt.s32.totalorder %s50_s8, %s50_s8 }
   0x6   :  { %p57_p3 = por %p56_p2, %p55_p1 }
   0x8   :  { %p58_p4 = pnand %p57_p3, %p51_p0 }
   0xa   :  { %61 = shalt.err (!%p58_p4)
}
   0xb   :  { %17 = dma.hbm_to_vmem [thread:$0]  %s104_s0, 256, %s15_s7, [#allocation3]  }
   0xc   :  { %82 = dma.done.wait [#allocation3], 256  }
   0xd   :  { %83 = vsyncadd [#allocation3], 4294967040  ;;  %s87_s11 = smov [#allocation5]   ;;  %v21_v0 = vld [vmem:[#allocation2] sm:$0xff]  ;;  %v22_v1 = vld [vmem:[#allocation2 + $0x8] sm:$0xff] }
   0xe   :  { %s31_s12 = sshll.u32 %s87_s11, 4  ;;  %23 = vst [vmem:[#allocation5] sm:$0xff] %v21_v0  ;;  %24 = vst [vmem:[#allocation5 + $0x8] sm:$0xff] %v22_v1  ;;  %s32_s12 = int_to_ptr.vmem [resolvable:$true] %s31_s12 }
   0xf   :  { %s62_s13 = scalar_lea.vmem %s32_s12, 256  ;;  %p67_p6 = scmp.lt.s32.totalorder %s32_s12, %s32_s12 }
  0x10   :  { %p63_p5 = scmp.ne.s32.totalorder %s32_s12, %s62_s13  ;;  %p68_p7 = scmp.lt.s32.totalorder %s62_s13, %s62_s13 }
  0x12   :  { %p69_p8 = por %p68_p7, %p67_p6 }
  0x14   :  { %p70_p9 = pnand %p69_p8, %p63_p5 }
  0x16   :  { %73 = shalt.err (!%p70_p9)
}
  0x17   :  { %34 = dma.vmem_to_hbm [thread:$0]  %s32_s12, 256, %s105_s1, [#allocation4]  }
  0x18   :  { %84 = dma.done.wait [#allocation4], 256  }
  0x19   :  { %85 = vsyncadd [#allocation4], 4294967040 }
  0x1a   :  { %38 = vsyncpa [#allocation3], 1 }
  0x1b   :  { %39 = vsyncpa [#allocation4], 1 }

</bundles_post_ra>
